<compile_context>
chip_gen: v7x
topology: tpu7x:2x2x1
jax: 0.10.0
libtpu: 0.0.40
codegen_flags: <defaults>
</compile_context>

<pallas_src>
import functools

import numpy as np
import jax
import jax.numpy as jnp
from jax import lax
from jax.experimental import pallas as pl
from jax.experimental.pallas import tpu as pltpu


# ----------------------------------------------------------------------------
# Static filter construction (numpy, trace time).
# ----------------------------------------------------------------------------
def _gaussian_kernel1d(kernel_size: int, sigma: float) -> np.ndarray:
    # Matches torchvision.transforms._functional_tensor._get_gaussian_kernel1d
    half = (kernel_size - 1) * 0.5
    x = np.linspace(-half, half, kernel_size)
    pdf = np.exp(-0.5 * (x / sigma) ** 2)
    return (pdf / pdf.sum()).astype(np.float32)


def _conv_matrix(n: int, taps: np.ndarray, reflect: bool) -> np.ndarray:
    """Dense (n, n) matrix M such that (M @ x) == 1-D conv of x with `taps`.

    reflect=True  -> reflect padding (torch F.pad mode='reflect') folded in.
    reflect=False -> zero padding (out-of-range taps simply dropped).
    Rows index the output position, columns the input position.
    """
    K = len(taps)
    p = K // 2
    if reflect and n <= p:
        raise ValueError(f"reflect padding requires dim > {p}, got {n}")
    M = np.zeros((n, n), dtype=np.float32)
    for i in range(n):
        for t in range(K):
            j = i - p + t
            if j < 0:
                if not reflect:
                    continue
                j = -j
            elif j >= n:
                if not reflect:
                    continue
                j = 2 * (n - 1) - j
            M[i, j] += float(taps[t])
    return M


def _pow(x, p):
    # gamma/beta are static hyperparameters; 0.5 (default) -> sqrt.
    if p == 0.5:
        return jnp.sqrt(x)
    return jnp.power(x, p)


# ----------------------------------------------------------------------------
# Kernel: one (P, H, W) plane-batch block per grid step.
# ----------------------------------------------------------------------------
def _fcm_kernel(gv_ref, bv_ref, ght_ref, bht_ref, x_ref, o_ref, *,
                gamma, beta, matmul_dtype, approx_recip):
    """
    x_ref  : (P, H, W) block of planes, native input dtype.
    gv/bv  : (H, H)  vertical Gaussian (reflect) / box (zero-pad) conv matrices.
    ght/bht: (W, W)  horizontal conv matrices, pre-transposed (right-multiplier).
    """
    P, H, W = x_ref.shape
    f32 = jnp.float32
    md = matmul_dtype

    def recip(v):
        if approx_recip:
            return pl.reciprocal(v, approx=True)  # EUP slot, frees the VALU
        return 1.0 / v

    xf = x_ref[...].astype(f32)            # cast in VMEM, not on the host
    x2 = xf * xf

    gv = gv_ref[...]
    bv = bv_ref[...]
    ght = ght_ref[...]
    bht = bht_ref[...]

    # Horizontal pass: contract the lane axis W with a (W, W) matrix.
    def hconv(t, mt):
        td = t.astype(md)
        if H % 8 == 0:
            # (P,H,W) -> (P*H,W) is a layout-free sublane merge -> one matmul.
            r = jnp.dot(td.reshape(P * H, W), mt, preferred_element_type=f32)
            return r.reshape(P, H, W)
        # Rare ragged-H path: per-plane batched matmul instead of a reshape.
        return lax.dot_general(td, jnp.broadcast_to(mt, (P, W, W)),
                               (((2,), (1,)), ((0,), (0,))),
                               preferred_element_type=f32)

    # Vertical pass: per-plane (H,H) @ (H,W), batched over P on the MXU.
    # Broadcasts hoisted (JAX does not CSE broadcast_in_dim).
    gvb = jnp.broadcast_to(gv, (P, H, H))
    bvb = jnp.broadcast_to(bv, (P, H, H))

    def vconv(t, mvb):
        return lax.dot_general(mvb, t.astype(md),
                               (((2,), (1,)), ((0,), (0,))),
                               preferred_element_type=f32)

    gauss = vconv(hconv(xf, ght), gvb)      # GaussianBlur(13, 2.0), reflect pad
    mean_box = vconv(hconv(xf, bht), bvb)   # 13x13 box mean of x,   zero pad
    sq_box = vconv(hconv(x2, bht), bvb)     # 13x13 box mean of x^2, zero pad

    # Local std.
    sq_mean_box = jnp.maximum(mean_box * mean_box, 1e-7)
    std_local = jnp.sqrt(jnp.abs(sq_box - sq_mean_box) + 1e-7)

    # Contrast masking.
    g_norm = (xf - gauss) * recip(jnp.abs(gauss) + 1e-7)
    msk = (g_norm > 0.0).astype(f32)        # torch's -1*zeros == 0.0
    g_norm = jnp.where(g_norm == 0.0, 1e-7, g_norm)
    norm_num = msk * _pow(jnp.abs(g_norm), gamma)

    local_norm = std_local * recip(jnp.abs(mean_box) + 1e-7)
    norm_den = 1.0 + _pow(local_norm, beta)

    o_ref[...] = (norm_num * recip(norm_den)).astype(o_ref.dtype)


# ----------------------------------------------------------------------------
# Wrapper.
# ----------------------------------------------------------------------------
def _vmem_capacity_bytes() -> int:
    try:
        cap = int(getattr(pltpu.get_tpu_info(), "vmem_capacity_bytes", 0) or 0)
        if cap > 0:
            return cap
    except Exception:
        pass
    # Generation-aware fallback: only v7x has 64 MiB per core; v5e/v6e: 128 MiB.
    try:
        kind = jax.devices()[0].device_kind.lower()
    except Exception:
        kind = ""
    if "v7" in kind:
        return 64 * 1024 * 1024
    return 128 * 1024 * 1024


def feature_contrast_masking(x, *, gamma=0.5, beta=0.5, kernel_size=13,
                             sigma=2.0, matmul_dtype=jnp.float32,
                             approx_reciprocal=True):
    """x: [B, C, H, W] -> contrast map of the same shape (math done in f32)."""
    B, C, H, W = x.shape
    K = kernel_size
    pad = K // 2
    if H <= pad or W <= pad:
        raise ValueError(f"reflect padding requires H, W > {pad}; got {H}x{W}")
    N = B * C

    # Static filter matrices with padding folded into the rows.
    g1d = _gaussian_kernel1d(K, sigma)
    b1d = np.full((K,), 1.0 / K, dtype=np.float32)
    gv = _conv_matrix(H, g1d, reflect=True)             # (H, H)
    bv = _conv_matrix(H, b1d, reflect=False)            # (H, H)
    ght = _conv_matrix(W, g1d, reflect=True).T          # (W, W) right-multiplier
    bht = _conv_matrix(W, b1d, reflect=False).T         # (W, W)

    mat_dtype = jnp.dtype(matmul_dtype)
    in_dtype = jnp.dtype(x.dtype)

    # ---- VMEM budget and plane-batch (P) selection --------------------------
    vmem_limit = (_vmem_capacity_bytes() * 3) // 4      # single hedge

    def padded_bytes(h, w, itemsize):
        # VMEM buffers pad the last two dims to the (8, 128) f32 tile.
        return (-(-h // 8) * 8) * (-(-w // 128) * 128) * itemsize

    def block_bytes(p):
        io = 4 * p * padded_bytes(H, W, in_dtype.itemsize)         # 2x in + 2x out
        temps = 8 * p * padded_bytes(H, W, 4)                      # live f32 temps
        bcast = 2 * p * padded_bytes(H, H, mat_dtype.itemsize)     # broadcast gv/bv
        filt = 2 * (padded_bytes(H, H, mat_dtype.itemsize)
                    + padded_bytes(W, W, mat_dtype.itemsize))      # resident filters
        return io + temps + bcast + filt

    divisors = [d for d in range(1, N + 1) if N % d == 0]
    fitting = [d for d in divisors if block_bytes(d) <= vmem_limit]
    if not fitting:
        # TODO(synk): halo-tiled spatial variant needed when one plane's working
        # set exceeds VMEM; fall back to P=1 and let the compiler report if OOM.
        P = 1
    else:
        # Keep >= 4 grid steps so the software pipeline overlaps DMA with
        # compute and both v7x TensorCores get work.
        min_steps = 4 if N >= 4 else N
        P = max(d for d in fitting if N // d >= min_steps)
    grid = (N // P,)

    # Free reshape, native dtype/layout — no host-side cast or transpose.
    x3d = x.reshape(N, H, W)

    kernel = functools.partial(_fcm_kernel, gamma=gamma, beta=beta,
                               matmul_dtype=mat_dtype,
                               approx_recip=approx_reciprocal)

    # Grid-invariant filters: whole-array VMEM operands (single copy,
    # no double buffering).
    filt_spec = pl.BlockSpec(memory_space=pltpu.MemorySpace.VMEM)

    out3d = pl.pallas_call(
        kernel,
        out_shape=jax.ShapeDtypeStruct((N, H, W), x.dtype),
        grid=grid,
        in_specs=[
            filt_spec,                                     # gv
            filt_spec,                                     # bv
            filt_spec,                                     # ght
            filt_spec,                                     # bht
            pl.BlockSpec((P, H, W), lambda i: (i, 0, 0)),  # x plane batch
        ],
        out_specs=pl.BlockSpec((P, H, W), lambda i: (i, 0, 0)),
        compiler_params=pltpu.CompilerParams(
            dimension_semantics=("parallel",),
            vmem_limit_bytes=vmem_limit),
    )(jnp.asarray(gv, dtype=mat_dtype), jnp.asarray(bv, dtype=mat_dtype),
      jnp.asarray(ght, dtype=mat_dtype), jnp.asarray(bht, dtype=mat_dtype),
      x3d)

    return out3d.reshape(B, C, H, W)


# ----------------------------------------------------------------------------
# Pure-JAX tap-based reference (exact divides) for validation.
# ----------------------------------------------------------------------------
def _reference_jax(x, *, gamma=0.5, beta=0.5, kernel_size=13, sigma=2.0):
    B, C, H, W = x.shape
    K = kernel_size
    p = K // 2
    g1d = jnp.asarray(_gaussian_kernel1d(K, sigma))
    b1d = jnp.full((K,), 1.0 / K, dtype=jnp.float32)

    xf = x.reshape(B * C, H, W).astype(jnp.float32)
    xr = jnp.pad(xf, ((0, 0), (p, p), (p, p)), mode="reflect")
    xz = jnp.pad(xf, ((0, 0), (p, p), (p, p)), mode="constant")

    def sep(xp, taps):
        t = sum(taps[i] * xp[:, :, i:i + W] for i in range(K))
        return sum(taps[i] * t[:, i:i + H, :] for i in range(K))

    gauss = sep(xr, g1d)
    mean_box = sep(xz, b1d)
    sq_box = sep(xz * xz, b1d)

    sq_mean_box = jnp.maximum(mean_box * mean_box, 1e-7)
    std_local = jnp.sqrt(jnp.abs(sq_box - sq_mean_box) + 1e-7)

    g_norm = (xf - gauss) / (jnp.abs(gauss) + 1e-7)
    msk = (g_norm > 0.0).astype(jnp.float32)
    g_norm = jnp.where(g_norm == 0.0, 1e-7, g_norm)
    norm_num = msk * jnp.power(jnp.abs(g_norm), gamma)

    local_norm = std_local / (jnp.abs(mean_box) + 1e-7)
    norm_den = 1.0 + jnp.power(local_norm, beta)
    return (norm_num / norm_den).reshape(B, C, H, W).astype(x.dtype)


if __name__ == "__main__":
    key = jax.random.PRNGKey(0)
    x = jax.random.normal(key, (2, 4, 16, 16), dtype=jnp.float32)

    # Default (f32 MXU) path: validated against the tap-based reference.
    out = feature_contrast_masking(x)
    jax.block_until_ready(out)
    assert out.shape == x.shape, (out.shape, x.shape)
    assert out.dtype == x.dtype
    assert bool(jnp.all(jnp.isfinite(out)))

    ref = _reference_jax(x)
    # Tolerance budget: MXU f32 matmul rounding + approx reciprocals (~1e-3).
    np.testing.assert_allclose(np.asarray(out), np.asarray(ref),
                               rtol=2e-2, atol=2e-2)

    # bf16 fast path (perf option from the review): shape/finite check only —
    # the |local mean| + 1e-7 denominators amplify bf16 rounding for
    # zero-mean synthetic inputs, so a tight comparison is not meaningful here.
    out_bf16 = feature_contrast_masking(x, matmul_dtype=jnp.bfloat16)
    jax.block_until_ready(out_bf16)
    assert out_bf16.shape == x.shape
    assert bool(jnp.all(jnp.isfinite(out_bf16)))

    print("KERNEL_OK")
</pallas_src>

<mosaic_0001>
module attributes {stable_mosaic.version = 11 : i64} {
  func.func @_fcm_kernel(%arg0: i32, %arg1: memref<16x16xf32, #tpu.memory_space<vmem>>, %arg2: memref<16x16xf32, #tpu.memory_space<vmem>>, %arg3: memref<16x16xf32, #tpu.memory_space<vmem>>, %arg4: memref<16x16xf32, #tpu.memory_space<vmem>>, %arg5: memref<2x16x16xf32, #tpu.memory_space<vmem>>, %arg6: memref<2x16x16xf32, #tpu.memory_space<vmem>>) attributes {dimension_semantics = [#tpu.dimension_semantics<parallel>], iteration_bounds = array<i64: 4>, scalar_prefetch = 0 : i64, scratch_operands = 0 : i64, tpu.core_type = #tpu.core_type<tc>, window_params = [{pipeline_mode = #tpu.pipeline_mode<synchronous>, transform_indices = @transform_0, window_bounds = array<i64: 16, 16>}, {pipeline_mode = #tpu.pipeline_mode<synchronous>, transform_indices = @transform_1, window_bounds = array<i64: 16, 16>}, {pipeline_mode = #tpu.pipeline_mode<synchronous>, transform_indices = @transform_2, window_bounds = array<i64: 16, 16>}, {pipeline_mode = #tpu.pipeline_mode<synchronous>, transform_indices = @transform_3, window_bounds = array<i64: 16, 16>}, {transform_indices = @transform_4, window_bounds = array<i64: 2, 16, 16>}, {transform_indices = @transform_5, window_bounds = array<i64: 2, 16, 16>}]} {
    %c0 = arith.constant 0 : index
    %c0_0 = arith.constant 0 : index
    %c0_1 = arith.constant 0 : index
    %0 = vector.load %arg5[%c0, %c0_0, %c0_1] : memref<2x16x16xf32, #tpu.memory_space<vmem>>, vector<2x16x16xf32>
    %1 = arith.mulf %0, %0 : vector<2x16x16xf32>
    %c0_2 = arith.constant 0 : index
    %c0_3 = arith.constant 0 : index
    %2 = vector.load %arg1[%c0_2, %c0_3] : memref<16x16xf32, #tpu.memory_space<vmem>>, vector<16x16xf32>
    %c0_4 = arith.constant 0 : index
    %c0_5 = arith.constant 0 : index
    %3 = vector.load %arg2[%c0_4, %c0_5] : memref<16x16xf32, #tpu.memory_space<vmem>>, vector<16x16xf32>
    %c0_6 = arith.constant 0 : index
    %c0_7 = arith.constant 0 : index
    %4 = vector.load %arg3[%c0_6, %c0_7] : memref<16x16xf32, #tpu.memory_space<vmem>>, vector<16x16xf32>
    %c0_8 = arith.constant 0 : index
    %c0_9 = arith.constant 0 : index
    %5 = vector.load %arg4[%c0_8, %c0_9] : memref<16x16xf32, #tpu.memory_space<vmem>>, vector<16x16xf32>
    %6 = vector.shape_cast %2 : vector<16x16xf32> to vector<1x16x16xf32>
    %7 = vector.broadcast %6 : vector<1x16x16xf32> to vector<2x16x16xf32>
    %8 = vector.shape_cast %3 : vector<16x16xf32> to vector<1x16x16xf32>
    %9 = vector.broadcast %8 : vector<1x16x16xf32> to vector<2x16x16xf32>
    %10 = vector.shape_cast %0 : vector<2x16x16xf32> to vector<32x16xf32>
    %cst = arith.constant dense<0.000000e+00> : vector<32x16xf32>
    %11 = tpu.matmul %10, %4, %cst {dimension_numbers = #tpu.dot_dimension_numbers<[1], [0], [0], [1], [0, 0, 1, 1], [], []>} : vector<32x16xf32>, vector<16x16xf32>, vector<32x16xf32> -> vector<32x16xf32>
    %12 = vector.shape_cast %11 : vector<32x16xf32> to vector<2x16x16xf32>
    %cst_10 = arith.constant dense<0.000000e+00> : vector<2x16x16xf32>
    %13 = tpu.matmul %7, %12, %cst_10 {dimension_numbers = #tpu.dot_dimension_numbers<[2], [1], [1], [2], [0, 0, 0, 1, 1, 2], [0], [0]>} : vector<2x16x16xf32>, vector<2x16x16xf32>, vector<2x16x16xf32> -> vector<2x16x16xf32>
    %14 = vector.shape_cast %0 : vector<2x16x16xf32> to vector<32x16xf32>
    %cst_11 = arith.constant dense<0.000000e+00> : vector<32x16xf32>
    %15 = tpu.matmul %14, %5, %cst_11 {dimension_numbers = #tpu.dot_dimension_numbers<[1], [0], [0], [1], [0, 0, 1, 1], [], []>} : vector<32x16xf32>, vector<16x16xf32>, vector<32x16xf32> -> vector<32x16xf32>
    %16 = vector.shape_cast %15 : vector<32x16xf32> to vector<2x16x16xf32>
    %cst_12 = arith.constant dense<0.000000e+00> : vector<2x16x16xf32>
    %17 = tpu.matmul %9, %16, %cst_12 {dimension_numbers = #tpu.dot_dimension_numbers<[2], [1], [1], [2], [0, 0, 0, 1, 1, 2], [0], [0]>} : vector<2x16x16xf32>, vector<2x16x16xf32>, vector<2x16x16xf32> -> vector<2x16x16xf32>
    %18 = vector.shape_cast %1 : vector<2x16x16xf32> to vector<32x16xf32>
    %cst_13 = arith.constant dense<0.000000e+00> : vector<32x16xf32>
    %19 = tpu.matmul %18, %5, %cst_13 {dimension_numbers = #tpu.dot_dimension_numbers<[1], [0], [0], [1], [0, 0, 1, 1], [], []>} : vector<32x16xf32>, vector<16x16xf32>, vector<32x16xf32> -> vector<32x16xf32>
    %20 = vector.shape_cast %19 : vector<32x16xf32> to vector<2x16x16xf32>
    %cst_14 = arith.constant dense<0.000000e+00> : vector<2x16x16xf32>
    %21 = tpu.matmul %9, %20, %cst_14 {dimension_numbers = #tpu.dot_dimension_numbers<[2], [1], [1], [2], [0, 0, 0, 1, 1, 2], [0], [0]>} : vector<2x16x16xf32>, vector<2x16x16xf32>, vector<2x16x16xf32> -> vector<2x16x16xf32>
    %22 = arith.mulf %17, %17 : vector<2x16x16xf32>
    %cst_15 = arith.constant 1.000000e-07 : f32
    %23 = vector.broadcast %cst_15 : f32 to vector<2x16x16xf32>
    %24 = arith.maximumf %22, %23 : vector<2x16x16xf32>
    %25 = arith.subf %21, %24 : vector<2x16x16xf32>
    %26 = math.absf %25 : vector<2x16x16xf32>
    %cst_16 = arith.constant 1.000000e-07 : f32
    %27 = vector.broadcast %cst_16 : f32 to vector<2x16x16xf32>
    %28 = arith.addf %26, %27 : vector<2x16x16xf32>
    %29 = math.sqrt %28 : vector<2x16x16xf32>
    %30 = arith.subf %0, %13 : vector<2x16x16xf32>
    %31 = math.absf %13 : vector<2x16x16xf32>
    %cst_17 = arith.constant 1.000000e-07 : f32
    %32 = vector.broadcast %cst_17 : f32 to vector<2x16x16xf32>
    %33 = arith.addf %31, %32 : vector<2x16x16xf32>
    %34 = tpu.reciprocal %33 {approx = true} : vector<2x16x16xf32> -> vector<2x16x16xf32>
    %35 = arith.mulf %30, %34 : vector<2x16x16xf32>
    %cst_18 = arith.constant 0.000000e+00 : f32
    %36 = vector.broadcast %cst_18 : f32 to vector<2x16x16xf32>
    %37 = arith.cmpf ogt, %35, %36 : vector<2x16x16xf32>
    %38 = arith.extui %37 : vector<2x16x16xi1> to vector<2x16x16xi32>
    %39 = arith.sitofp %38 : vector<2x16x16xi32> to vector<2x16x16xf32>
    %cst_19 = arith.constant 0.000000e+00 : f32
    %40 = vector.broadcast %cst_19 : f32 to vector<2x16x16xf32>
    %41 = arith.cmpf oeq, %35, %40 : vector<2x16x16xf32>
    %cst_20 = arith.constant 1.000000e-07 : f32
    %42 = vector.broadcast %cst_20 : f32 to vector<2x16x16xf32>
    %43 = arith.select %41, %42, %35 : vector<2x16x16xi1>, vector<2x16x16xf32>
    %44 = math.absf %43 : vector<2x16x16xf32>
    %45 = math.sqrt %44 : vector<2x16x16xf32>
    %46 = arith.mulf %39, %45 : vector<2x16x16xf32>
    %47 = math.absf %17 : vector<2x16x16xf32>
    %cst_21 = arith.constant 1.000000e-07 : f32
    %48 = vector.broadcast %cst_21 : f32 to vector<2x16x16xf32>
    %49 = arith.addf %47, %48 : vector<2x16x16xf32>
    %50 = tpu.reciprocal %49 {approx = true} : vector<2x16x16xf32> -> vector<2x16x16xf32>
    %51 = arith.mulf %29, %50 : vector<2x16x16xf32>
    %52 = math.sqrt %51 : vector<2x16x16xf32>
    %cst_22 = arith.constant 1.000000e+00 : f32
    %53 = vector.broadcast %cst_22 : f32 to vector<2x16x16xf32>
    %54 = arith.addf %53, %52 : vector<2x16x16xf32>
    %55 = tpu.reciprocal %54 {approx = true} : vector<2x16x16xf32> -> vector<2x16x16xf32>
    %56 = arith.mulf %46, %55 : vector<2x16x16xf32>
    %c0_23 = arith.constant 0 : index
    %c0_24 = arith.constant 0 : index
    %c0_25 = arith.constant 0 : index
    %57 = vector.load %arg6[%c0_23, %c0_24, %c0_25] : memref<2x16x16xf32, #tpu.memory_space<vmem>>, vector<2x16x16xf32>
    tpu.vector_store %arg6[%c0_23, %c0_24, %c0_25], %56 {strides = array<i32>} : memref<2x16x16xf32, #tpu.memory_space<vmem>>, vector<2x16x16xf32>,
    return
  }
  func.func @transform_0(%arg0: i32) -> (i32, i32) {
    %c0_i32 = arith.constant 0 : i32
    %c0_i32_0 = arith.constant 0 : i32
    %c0_i32_1 = arith.constant 0 : i32
    return %c0_i32, %c0_i32_0 : i32, i32
  }
  func.func @transform_1(%arg0: i32) -> (i32, i32) {
    %c0_i32 = arith.constant 0 : i32
    %c0_i32_0 = arith.constant 0 : i32
    %c0_i32_1 = arith.constant 0 : i32
    return %c0_i32, %c0_i32_0 : i32, i32
  }
  func.func @transform_2(%arg0: i32) -> (i32, i32) {
    %c0_i32 = arith.constant 0 : i32
    %c0_i32_0 = arith.constant 0 : i32
    %c0_i32_1 = arith.constant 0 : i32
    return %c0_i32, %c0_i32_0 : i32, i32
  }
  func.func @transform_3(%arg0: i32) -> (i32, i32) {
    %c0_i32 = arith.constant 0 : i32
    %c0_i32_0 = arith.constant 0 : i32
    %c0_i32_1 = arith.constant 0 : i32
    return %c0_i32, %c0_i32_0 : i32, i32
  }
  func.func @transform_4(%arg0: i32) -> (i32, i32, i32) {
    %c0_i32 = arith.constant 0 : i32
    %c0_i32_0 = arith.constant 0 : i32
    %c0_i32_1 = arith.constant 0 : i32
    return %arg0, %c0_i32, %c0_i32_0 : i32, i32, i32
  }
  func.func @transform_5(%arg0: i32) -> (i32, i32, i32) {
    %c0_i32 = arith.constant 0 : i32
    %c0_i32_0 = arith.constant 0 : i32
    %c0_i32_1 = arith.constant 0 : i32
    return %arg0, %c0_i32, %c0_i32_0 : i32, i32, i32
  }
}

</mosaic_0001>

<bundles_post_ra>
// kernel: tpu_custom_call.1
= control target key start
LH: loop header
LB: loop body
LE: loop exit
PB: predicated region body
PF: predicated region fallthrough
CT: control target
= control target key end

     0   :  { %10 = vsyncpa [#allocation3], 0  ;;  %s2417_s0 = inlined_call_operand.hbm [shape: f32[16,16], index: 0, kind: input, shape index: {}]   ;;  %s2418_s1 = inlined_call_operand.hbm [shape: f32[16,16], index: 1, kind: input, shape index: {}]   ;;  %s2419_s2 = inlined_call_operand.hbm [shape: f32[16,16], index: 2, kind: input, shape index: {}]   ;;  %s2420_s3 = inlined_call_operand.hbm [shape: f32[16,16], index: 3, kind: input, shape index: {}]   ;;  %s2421_s4 = inlined_call_operand.hbm [shape: f32[8,16,16], index: 4, kind: input, shape index: {}]   ;;  %s2422_s5 = inlined_call_operand.hbm [shape: f32[8,16,16], index: 5, kind: output, shape index: {}]  }
   0x1   :  { %11 = vsyncpa [#allocation6], 0 }
   0x2   :  { %12 = vsyncpa [#allocation9], 0 }
   0x3   :  { %13 = vsyncpa [#allocation4], 0 }
   0x4   :  { %15 = vsyncpa [#allocation4 + $0x1], 0  ;;  %s1979_s18 = smov 0   ;;  %s1981_s19 = smov 0  }
   0x5   :  { %s1983_s20 = smov 0   ;;  %s1985_s21 = smov 0  }
   0x6 LB: > { %s2000_s22 = sadd.s32 4294967295, %s1936_s21   ;;  %s1370_s23 = sadd.s32 4294967294, %s1936_s21   ;;  %s1936_s21 = sphi %s1985_s21, %s2446_s21   ;;  %s1932_s20 = sphi %s1983_s20, %s2445_s20   ;;  %s1928_s19 = sphi %s1981_s19, %s2444_s19   ;;  %s1924_s18 = sphi %s1979_s18, %s2443_s18  }
   0x7   : > { %p125_p0 = scmp.ne.s32.totalorder %s1928_s19, %s1924_s18  ;;  %p2423_p1 = scmp.eq.s32.totalorder %s2000_s22, 0 }
   0x8   : > { %p155_p3 = scmp.eq.s32.totalorder %s1370_s23, 3  ;;  %p1371_p5 = scmp.ge.s32.totalorder %s1936_s21, 1 }
   0x9   : > { %p2009_p4 = por %p2423_p1, %p125_p0  ;;  %p162_p7 = scmp.lt.s32.totalorder %s1936_s21, 5 }
   0xa   : > { %p2014_p6 = por %p155_p3, %p125_p0  ;;  %s1938_s27 = smov [#allocation2]  }
   0xb   : > { %s2426_s24 = scalar_select %p2009_p4, 1, 0 }
   0xc   : > { %s2427_s25 = scalar_select %p2014_p6, 1, 0 }
   0xd   : > { %p2019_p8 = pnand %p1371_p5, %p162_p7  ;;  %s174_s28 = sshll.u32 %s1938_s27, 4  ;;  %s2023_s28 = int_to_ptr.vmem [resolvable:$true] %s174_s28 }
   0xe   : > { %s1939_s30 = smov [#allocation5]   ;;  %s1940_s7 = smov [#allocation7]  }
   0xf   : > { %s2428_s26 = scalar_select %p2019_p8, 1, 0 }
  0x10   : > { %p1596_p9 = pneg %p2019_p8  ;;  %s187_s6 = sshll.u32 %s1939_s30, 4  ;;  %s2033_s6 = int_to_ptr.vmem [resolvable:$true] %s187_s6 }
  0x11   : > { %s2035_s8 = sshll.u32 %s1940_s7, 4  ;;  %s1716_s11 = scalar_lea.hbm %s2417_s0, 256  ;;  %s201_s8 = int_to_ptr.vmem [resolvable:$true] %s2035_s8 }
  0x12   : > { %p2029_p10 = pnand %p1596_p9, %p2423_p1  ;;  %p1717_p11 = scmp.ne.s32.totalorder %s2417_s0, %s1716_s11 }
  0x13   : > { %p1723_p3 = scmp.lt.u32.totalorder %s1716_s11, %s2417_s0 }
  0x14   : > { %p2045_p12 = pneg %p2029_p10 }
  0x16   : > { %p1719_p13 = pnand %p2045_p12, %p1717_p11 }
  0x18   : > { %p1720_p0 = pneg %p1719_p13 }
  0x1a   : > { %p1725_p5 = pnand %p1723_p3, %p1720_p0 }
  0x1c   : > { %1728 = shalt.err (!%p1725_p5)
}
  0x1d   : > { %s1729_s17 = scalar_lea.vmem %s2023_s28, 256  ;;  %p1737_p2 = scmp.lt.s32.totalorder %s2023_s28, %s2023_s28 }
  0x1e   : > { %p1730_p7 = scmp.ne.s32.totalorder %s2023_s28, %s1729_s17  ;;  %p1738_p6 = scmp.lt.s32.totalorder %s1729_s17, %s1729_s17 }
  0x20   : > { %p1732_p9 = pnand %p1730_p7, %p2045_p12  ;;  %p1739_p11 = por %p1738_p6, %p1737_p2 }
  0x22   : > { %p1733_p1 = pneg %p1732_p9 }
  0x24   : > { %p1740_p13 = pnand %p1739_p11, %p1733_p1 }
  0x26   : > { %1743 = shalt.err (!%p1740_p13)
}
  0x27   : > { %s1941_s23 = smov 128   ;;  %s1942_s27 = smov 8  }
  0x28   : > { %1599 = dma.hbm_to_vmem [thread:$0]  (!%p2029_p10), %s2417_s0, 256, %s2023_s28, [#allocation3], %s1941_s23, %s1941_s23, %s1942_s27  }
  0x29   : > { %s1744_s11 = scalar_lea.hbm %s2418_s1, 256 }
  0x2a   : > { %p1745_p1 = scmp.ne.s32.totalorder %s2418_s1, %s1744_s11  ;;  %p1751_p0 = scmp.lt.u32.totalorder %s1744_s11, %s2418_s1 }
  0x2c   : > { %p1747_p2 = pnand %p1745_p1, %p2045_p12 }
  0x2e   : > { %p1748_p6 = pneg %p1747_p2 }
  0x30   : > { %p1753_p3 = pnand %p1751_p0, %p1748_p6 }
  0x32   : > { %1756 = shalt.err (!%p1753_p3)
}
  0x33   : > { %s1757_s28 = scalar_lea.vmem %s2033_s6, 256  ;;  %p1765_p11 = scmp.lt.s32.totalorder %s2033_s6, %s2033_s6 }
  0x34   : > { %p1758_p5 = scmp.ne.s32.totalorder %s2033_s6, %s1757_s28  ;;  %p1766_p13 = scmp.lt.s32.totalorder %s1757_s28, %s1757_s28 }
  0x36   : > { %p1760_p7 = pnand %p1758_p5, %p2045_p12  ;;  %p1767_p1 = por %p1766_p13, %p1765_p11 }
  0x38   : > { %p1761_p9 = pneg %p1760_p7 }
  0x3a   : > { %p1768_p2 = pnand %p1767_p1, %p1761_p9 }
  0x3c   : > { %1771 = shalt.err (!%p1768_p2)
}
  0x3d   : > { %1602 = dma.hbm_to_vmem [thread:$0]  (!%p2029_p10), %s2418_s1, 256, %s2033_s6, [#allocation6], %s1941_s23, %s1941_s23, %s1942_s27  }
  0x3e   : > { %s1772_s10 = scalar_lea.hbm %s2419_s2, 256 }
  0x3f   : > { %p1773_p6 = scmp.ne.s32.totalorder %s2419_s2, %s1772_s10  ;;  %p1779_p5 = scmp.lt.u32.totalorder %s1772_s10, %s2419_s2 }
  0x41   : > { %p1775_p0 = pnand %p1773_p6, %p2045_p12 }
  0x43   : > { %p1776_p3 = pneg %p1775_p0 }
  0x45   : > { %p1781_p7 = pnand %p1779_p5, %p1776_p3 }
  0x47   : > { %1784 = shalt.err (!%p1781_p7)
}
  0x48   : > { %s1785_s16 = scalar_lea.vmem %s201_s8, 256  ;;  %p1793_p1 = scmp.lt.s32.totalorder %s201_s8, %s201_s8 }
  0x49   : > { %p1786_p9 = scmp.ne.s32.totalorder %s201_s8, %s1785_s16  ;;  %p1794_p2 = scmp.lt.s32.totalorder %s1785_s16, %s1785_s16 }
  0x4b   : > { %p1788_p11 = pnand %p1786_p9, %p2045_p12  ;;  %p1795_p4 = por %p1794_p2, %p1793_p1 }
  0x4d   : > { %p1789_p13 = pneg %p1788_p11 }
  0x4f   : > { %p1796_p8 = pnand %p1795_p4, %p1789_p13 }
  0x51   : > { %1799 = shalt.err (!%p1796_p8)
}
  0x52   : > { %1605 = dma.hbm_to_vmem [thread:$0]  (!%p2029_p10), %s2419_s2, 256, %s201_s8, [#allocation6], %s1941_s23, %s1941_s23, %s1942_s27  }
  0x53   : > { %s1943_s17 = smov [#allocation8]   ;;  %s1800_s10 = scalar_lea.hbm %s2420_s3, 256 }
  0x54   : > { %s213_s30 = sshll.u32 %s1943_s17, 4  ;;  %p1801_p4 = scmp.ne.s32.totalorder %s2420_s3, %s1800_s10  ;;  %s214_s30 = int_to_ptr.vmem [resolvable:$true] %s213_s30 }
  0x55   : > { %p1807_p0 = scmp.lt.u32.totalorder %s1800_s10, %s2420_s3 }
  0x56   : > { %p1803_p8 = pnand %p1801_p4, %p2045_p12 }
  0x58   : > { %p1804_p6 = pneg %p1803_p8 }
  0x5a   : > { %p1809_p3 = pnand %p1807_p0, %p1804_p6 }
  0x5c   : > { %1812 = shalt.err (!%p1809_p3)
}
  0x5d   : > { %s1813_s8 = scalar_lea.vmem %s214_s30, 256  ;;  %p1821_p11 = scmp.lt.s32.totalorder %s214_s30, %s214_s30 }
  0x5e   : > { %p1814_p5 = scmp.ne.s32.totalorder %s214_s30, %s1813_s8  ;;  %p1822_p13 = scmp.lt.s32.totalorder %s1813_s8, %s1813_s8 }
  0x60   : > { %p1816_p7 = pnand %p1814_p5, %p2045_p12  ;;  %p1823_p1 = por %p1822_p13, %p1821_p11 }
  0x62   : > { %p1817_p9 = pneg %p1816_p7 }
  0x64   : > { %p1824_p2 = pnand %p1823_p1, %p1817_p9 }
  0x66   : > { %1827 = shalt.err (!%p1824_p2)
}
  0x67   : > { %1608 = dma.hbm_to_vmem [thread:$0]  (!%p2029_p10), %s2420_s3, 256, %s214_s30, [#allocation9], %s1941_s23, %s1941_s23, %s1942_s27  }
  0x68   : > { %s2139_s29 = sadd.s32 1, %s1936_s21   ;;  %s112_s14 = sadd.s32 1, %s1932_s20 }
  0x69   : > { %s109_s28 = ssub.s32 %s1936_s21, %s2139_s29  ;;  %p119_p12 = scmp.ne.s32.totalorder %s1932_s20, %s1928_s19 }
  0x6a   : > { %p110_p4 = scmp.eq.s32.totalorder %s109_s28, 0  ;;  %p120_p8 = scmp.eq.s32.totalorder %s1936_s21, 0 }
  0x6b   : > { %p2431_p6 = scmp.eq.s32.totalorder %s2000_s22, 3  ;;  %p1621_p3 = scmp.lt.s32.totalorder %s1936_s21, 4 }
  0x6c   : > { %s2155_s7 = scalar_select %p110_p4, %s1932_s20, %s112_s14  }
  0x6d   : > { %p2149_p0 = por %p2431_p6, %p119_p12  ;;  %p121_p5 = por %p120_p8, %p119_p12 }
  0x6e   : > { %s227_s9 = sand.u32 1, %s1936_s21   ;;  %s229_s10 = sand.u32 1, %s1932_s20  }
  0x6f   : > { %s1377_s30 = sshll.u32 %s229_s10, 5  ;;  %s1423_s11 = sshll.u32 %s1936_s21, 9 }
  0x70   : > { %s2163_s15 = scalar_lea.hbm %s2421_s4, %s1423_s11  ;;  %s231_s8 = scalar_lea.vmem [#allocation10], %s1377_s30 }
  0x71   : > { %s239_s16 = sshll.u32 %s231_s8, 4  ;;  %p2165_p10 = pnand %p1621_p3, %p121_p5  ;;  %s2169_s16 = int_to_ptr.vmem [resolvable:$true] %s239_s16 }
  0x72   : > { %s2171_s14 = scalar_lea.sflag [#allocation3], %s227_s9  ;;  %s1828_s28 = scalar_lea.hbm %s2163_s15, 512 }
  0x73   : > { %p1829_p7 = scmp.ne.s32.totalorder %s2163_s15, %s1828_s28  ;;  %p1830_p9 = pneg %p2165_p10 }
  0x74   : > { %s1833_s11 = scalar_lea.hbm %s2421_s4, 2048  ;;  %p1834_p1 = scmp.lt.u32.totalorder %s2163_s15, %s2421_s4 }
  0x75   : > { %p1831_p11 = pnand %p1830_p9, %p1829_p7  ;;  %p1835_p2 = scmp.lt.u32.totalorder %s1833_s11, %s1828_s28 }
  0x76   : > { %p1837_p4 = scmp.lt.u32.totalorder %s1828_s28, %s2163_s15 }
  0x77   : > { %p1832_p13 = pneg %p1831_p11  ;;  %p1836_p12 = por %p1835_p2, %p1834_p1 }
  0x79   : > { %p1838_p8 = por %p1837_p4, %p1836_p12 }
  0x7b   : > { %p1839_p6 = pnand %p1838_p8, %p1832_p13 }
  0x7d   : > { %1842 = shalt.err (!%p1839_p6)
}
  0x7e   : > { %s1843_s9 = scalar_lea.vmem %s2169_s16, 512  ;;  %s1944_s8 = smov [#allocation10]  }
  0x7f   : > { %p1844_p3 = scmp.ne.s32.totalorder %s2169_s16, %s1843_s9  ;;  %s1848_s10 = sshll.u32 %s1944_s8, 4  ;;  %s1849_s10 = int_to_ptr.vmem [resolvable:$false] %s1848_s10 }
  0x80   : > { %s1850_s30 = scalar_lea.vmem %s1849_s10, 1024  ;;  %p1851_p11 = scmp.lt.s32.totalorder %s2169_s16, %s1849_s10 }
  0x81   : > { %p1846_p5 = pnand %p1844_p3, %p1830_p9  ;;  %p1852_p1 = scmp.lt.s32.totalorder %s1850_s30, %s1843_s9 }
  0x83   : > { %p1847_p7 = pneg %p1846_p5  ;;  %p1853_p2 = por %p1852_p1, %p1851_p11 }
  0x85   : > { %p1854_p12 = pnand %p1853_p2, %p1847_p7 }
  0x87   : > { %1857 = shalt.err (!%p1854_p12)
}
  0x88   : > { %1612 = dma.hbm_to_vmem [thread:$0]  (!%p2165_p10), %s2163_s15, 512, %s2169_s16, %s2171_s14, %s1941_s23, %s1941_s23, %s1942_s27  }
  0x89   : > { %p2434_p9 = scmp.ne.s32.totalorder %s2428_s26, 0 }
  0x8a   : > { %p2435_p13 = scmp.eq.s32.totalorder (!%p2434_p9), %s2000_s22, 0 }
  0x8b   : > { %251 = sbr.rel (%p2434_p9) target bundleno = 686 (0x2ae), region = 40 }
  0x92   : > { %1903 = dma.done.wait (%p2435_p13), [#allocation3], 256   ;;  %p2436_p4 = pmov %p2435_p13 }
  0x94   : > { %1905 = vsyncadd (%p2436_p4), [#allocation3], 4294967040  ;;  %p2437_p8 = pmov %p2436_p4 }
  0x95   : > { %p2438_p6 = pmov %p2436_p4 }
  0x96   : > { %1907 = dma.done.wait (%p2437_p8), [#allocation6], 512  }
  0x97   : > { %1909 = vsyncadd (%p2438_p6), [#allocation6], 4294966784  ;;  %p2439_p3 = pmov %p2436_p4 }
  0x99   : > { %1911 = dma.done.wait (%p2439_p3), [#allocation9], 256   ;;  %p2440_p10 = pmov %p2439_p3 }
  0x9a   : > { %s269_s26 = sand.u32 1, %s2000_s22   ;;  %s271_s23 = sand.u32 1, %s1928_s19  }
  0x9b   : > { %1913 = vsyncadd (%p2440_p10), [#allocation9], 4294967040  ;;  %s2220_s27 = sshll.u32 %s271_s23, 5  ;;  %s270_s15 = scalar_lea.sflag [#allocation3], %s269_s26 }
  0x9c   : > { %s273_s16 = scalar_lea.vmem [#allocation10], %s2220_s27  ;;  %p2441_p5 = scmp.ne.s32.totalorder %s2426_s24, 0 }
  0x9e   : > { %1915 = dma.done.wait (%p2441_p5), %s270_s15, 512  }
  0x9f   : > { %1917 = vsyncadd (%p2441_p5), %s270_s15, 4294966784  ;;  %vm318_vm0 = vcmask 130048   ;;  %v314_v0 = vld [vmem:[#allocation7] sm:$0xff]  ;;  %v315_v1 = vld [vmem:[#allocation7 + $0x8] sm:$0xff]  ;;  %s299_s24 = scalar_lea.vmem [#allocation11], %s2220_s27  ;;  %s1425_s6 = sshll.u32 %s2000_s22, 9 }
  0xa0   : > { %v2227_v2 = vld [vmem:[%s273_s16] sm:$0xff]  ;;  %v1540_v3 = vpack.c.bf16 %v315_v1, %v314_v0  ;;  %v316_v4 = vld [vmem:[#allocation8] sm:$0xff]  ;;  %v317_v5 = vld [vmem:[#allocation8 + $0x8] sm:$0xff]  ;;  %s1259_s14 = sshll.u32 %s299_s24, 4  ;;  %s2368_s12 = scalar_lea.hbm %s2422_s5, %s1425_s6  ;;  %s2370_s14 = int_to_ptr.vmem [resolvable:$true] %s1259_s14 }
  0xa1   : > { %1472 = vmatprep.mubr.msk.f32.mxu0 %vm318_vm0, %v2227_v2  ;;  %v1552_v6 = vpack.c.bf16 %v317_v5, %v316_v4  ;;  %v2231_v7 = vld [vmem:[%s273_s16 + $0x8] sm:$0xff]  ;;  %v2233_v8 = vld [vmem:[%s273_s16 + $0x10] sm:$0xff]  ;;  %v2239_v9 = vld [vmem:[%s273_s16 + $0x18] sm:$0xff]  ;;  %v306_v10 = vmul.f32 %v2227_v2, %v2227_v2  ;;  %s2376_s22 = scalar_lea.sflag [#allocation4], %s271_s23  ;;  %s1858_s13 = scalar_lea.vmem %s2370_s14, 512 }
  0xa2   : > { %1541 = vmatprep.subr.bf16.mxu0 %v1540_v3  ;;  %v307_v11 = vmul.f32 %v2231_v7, %v2231_v7  ;;  %v308_v12 = vmul.f32 %v2233_v8, %v2233_v8  ;;  %v309_v13 = vmul.f32 %v2239_v9, %v2239_v9  ;;  %v310_v14 = vld [vmem:[#allocation2] sm:$0xff]  ;;  %v311_v20 = vld [vmem:[#allocation2 + $0x8] sm:$0xff]  ;;  %v312_v25 = vld [vmem:[#allocation5] sm:$0xff]  ;;  %p1859_p7 = scmp.ne.s32.totalorder %s2370_s14, %s1858_s13  ;;  %s1946_s9 = smov [#allocation11]  }
  0xa3   : > { %1543 = vmatpush3.bf16.msra.mxu0 %v1540_v3  ;;  %1482 = vmatprep.mubr.msk.f32.mxu1 %vm318_vm0, %v310_v14  ;;  %v313_v28 = vld [vmem:[#allocation5 + $0x8] sm:$0xff]  ;;  %s1862_s8 = sshll.u32 %s1946_s9, 4  ;;  %s1863_s8 = int_to_ptr.vmem [resolvable:$false] %s1862_s8 }
  0xa4   : > { %1553 = vmatprep.subr.bf16.mxu0 %v1552_v6  ;;  %p1860_p11 = pnand %p1859_p7, %p2149_p0  ;;  %s1864_s10 = scalar_lea.vmem %s1863_s8, 1024 }
  0xa5   : > { %p1865_p2 = scmp.lt.s32.totalorder %s2370_s14, %s1863_s8  ;;  %p1866_p12 = scmp.lt.s32.totalorder %s1864_s10, %s1858_s13 }
  0xa6   : > { %1473 = vmatmul.mubr.msk.f32.vlgmr.msra.gmra.mrb[0].mxu0 %vm318_vm0, %v2231_v7  ;;  %p1861_p1 = pneg %p1860_p11 }
  0xa7   : > { %1555 = vmatpush3.bf16.msra.mxu0 %v1552_v6  ;;  %1475 = vmatprep.mubr.msk.f32.mxu0 %vm318_vm0, %v2233_v8  ;;  %p1867_p9 = por %p1866_p12, %p1865_p2 }
  0xa8   : > { %1565 = vmatprep.subr.bf16.mxu0 %v1552_v6 }
  0xa9   : > { %p1868_p13 = pnand %p1867_p9, %p1861_p1 }
  0xaa   : > { %1476 = vmatmul.mubr.msk.f32.gmra.mrb[2].mxu0 %vm318_vm0, %v2239_v9 }
  0xab   : > { %1496 = vmatprep.mubr.msk.f32.mxu0 %vm318_vm0, %v2227_v2 }
  0xae   : > { %1497 = vmatmul.mubr.msk.f32.vlgmr.msra.gmra.mrb[4].mxu0 %vm318_vm0, %v2231_v7 }
  0xaf   : > { %1567 = vmatpush3.bf16.msra.mxu0 %v1552_v6  ;;  %1499 = vmatprep.mubr.msk.f32.mxu0 %vm318_vm0, %v2233_v8 }
  0xb2   : > { %1500 = vmatmul.mubr.msk.f32.gmra.mrb[6].mxu0 %vm318_vm0, %v2239_v9 }
  0xb3   : > { %1520 = vmatprep.mubr.msk.f32.mxu0 %vm318_vm0, %v306_v10 }
  0xb6   : > { %1521 = vmatmul.mubr.msk.f32.vlgmr.msra.gmra.mrb[8].mxu0 %vm318_vm0, %v307_v11 }
  0xb7   : > { %1523 = vmatprep.mubr.msk.f32.mxu0 %vm318_vm0, %v308_v12 }
  0xba   : > { %1524 = vmatmul.mubr.msk.f32.gmra.mrb[10].mxu0 %vm318_vm0, %v309_v13 }
 0x179   : > { %v1474_v15 = vpop.f32.mrb[0].mxu0 }
 0x17a   : > { %v397_v16 = vpop.f32.mrb[1].mxu0 }
 0x17b   : > { %v1544_v17 = vpack.c.bf16 %v1474_v15, %v397_v16 }
 0x17d   : > { %v1477_v18 = vpop.f32.mrb[2].mxu0  ;;  %1545 = vmatprep.subr.bf16.mxu1 %v1544_v17 }
 0x17e   : > { %v407_v19 = vpop.f32.mrb[3].mxu0  ;;  %1547 = vmatpush3.bf16.msra.mxu1 %v1544_v17 }
 0x17f   : > { %v1548_v21 = vpack.c.bf16 %v1477_v18, %v407_v19 }
 0x181   : > { %1483 = vmatmul.mubr.msk.f32.vlgmr.msra.gmra.mrb[0].mxu1 %vm318_vm0, %v311_v20  ;;  %1549 = vmatprep.subr.bf16.mxu1 %v1548_v21  ;;  %v1498_v22 = vpop.f32.mrb[4].mxu0 }
 0x182   : > { %1551 = vmatpush3.bf16.msra.mxu1 %v1548_v21  ;;  %v638_v23 = vpop.f32.mrb[5].mxu0  ;;  %1489 = vmatprep.mubr.msk.f32.mxu1 %vm318_vm0, %v310_v14 }
 0x183   : > { %v1556_v24 = vpack.c.bf16 %v1498_v22, %v638_v23 }
 0x185   : > { %1490 = vmatmul.mubr.msk.f32.vlgmr.msra.gmra.mrb[2].mxu1 %vm318_vm0, %v311_v20  ;;  %v1501_v26 = vpop.f32.mrb[6].mxu0  ;;  %1557 = vmatprep.subr.bf16.mxu1 %v1556_v24 }
 0x186   : > { %v648_v27 = vpop.f32.mrb[7].mxu0  ;;  %1559 = vmatpush3.bf16.msra.mxu1 %v1556_v24  ;;  %1506 = vmatprep.mubr.msk.f32.mxu1 %vm318_vm0, %v312_v25 }
 0x187   : > { %v1560_v29 = vpack.c.bf16 %v1501_v26, %v648_v27 }
 0x189   : > { %1507 = vmatmul.mubr.msk.f32.vlgmr.msra.gmra.mrb[4].mxu1 %vm318_vm0, %v313_v28  ;;  %1561 = vmatprep.subr.bf16.mxu1 %v1560_v29  ;;  %v1522_v30 = vpop.f32.mrb[8].mxu0 }
 0x18a   : > { %1563 = vmatpush3.bf16.msra.mxu1 %v1560_v29  ;;  %v891_v31 = vpop.f32.mrb[9].mxu0  ;;  %1513 = vmatprep.mubr.msk.f32.mxu1 %vm318_vm0, %v312_v25 }
 0x18b   : > { %v1568_v32 = vpack.c.bf16 %v1522_v30, %v891_v31 }
 0x18d   : > { %1514 = vmatmul.mubr.msk.f32.vlgmr.msra.gmra.mrb[6].mxu1 %vm318_vm0, %v313_v28  ;;  %v1525_v33 = vpop.f32.mrb[10].mxu0  ;;  %1569 = vmatprep.subr.bf16.mxu1 %v1568_v32 }
 0x18e   : > { %v901_v34 = vpop.f32.mrb[11].mxu0  ;;  %1571 = vmatpush3.bf16.msra.mxu1 %v1568_v32  ;;  %1530 = vmatprep.mubr.msk.f32.mxu1 %vm318_vm0, %v312_v25 }
 0x18f   : > { %v1572_v35 = vpack.c.bf16 %v1525_v33, %v901_v34 }
 0x191   : > { %1531 = vmatmul.mubr.msk.f32.vlgmr.msra.gmra.mrb[8].mxu1 %vm318_vm0, %v313_v28  ;;  %1573 = vmatprep.subr.bf16.mxu1 %v1572_v35 }
 0x192   : > { %1575 = vmatpush3.bf16.msra.mxu1 %v1572_v35  ;;  %1537 = vmatprep.mubr.msk.f32.mxu1 %vm318_vm0, %v312_v25 }
 0x195   : > { %1538 = vmatmul.mubr.msk.f32.vlgmr.msra.gmra.mrb[10].mxu1 %vm318_vm0, %v313_v28 }
 0x254   : > { %v1484_v36 = vpop.f32.mrb[0].mxu1 }
 0x255   : > { %v488_v37 = vpop.f32.mrb[1].mxu1  ;;  %v1113_v42 = vand.u32 2147483647, %v1484_v36  ;;  %v1109_v16 = vsub.f32 %v2231_v7, %v1484_v36 }
 0x256   : > { %v1112_v43 = vand.u32 2147483647, %v488_v37  ;;  %v1108_v17 = vsub.f32 %v2227_v2, %v488_v37 }
 0x257   : > { %v1117_v48 = vadd.f32 1e-07, %v1113_v42 }
 0x258   : > { %v2275_v38 = vpop.f32.mrb[2].mxu1  ;;  %v1116_v49 = vadd.f32 1e-07, %v1112_v43 }
 0x259   : > { %v2277_v39 = vpop.f32.mrb[3].mxu1  ;;  %1668 = vrcp.f32 %v1117_v48  ;;  %v1115_v56 = vand.u32 2147483647, %v2275_v38  ;;  %v1111_v32 = vsub.f32 %v2239_v9, %v2275_v38 }
 0x25a   : > { %1670 = vrcp.f32 %v1116_v49  ;;  %v1114_v59 = vand.u32 2147483647, %v2277_v39  ;;  %v1110_v34 = vsub.f32 %v2233_v8, %v2277_v39 }
 0x25b   : > { %v1119_v0 = vadd.f32 1e-07, %v1115_v56 }
 0x25c   : > { %v1508_v40 = vpop.f32.mrb[4].mxu1  ;;  %v1118_v3 = vadd.f32 1e-07, %v1114_v59 }
 0x25d   : > { %v729_v41 = vpop.f32.mrb[5].mxu1  ;;  %v1061_v44 = vmul.f32 %v1508_v40, %v1508_v40  ;;  %v1185_v5 = vand.u32 2147483647, %v1508_v40  ;;  %1672 = vrcp.f32 %v1119_v0 }
 0x25e   : > { %v1060_v45 = vmul.f32 %v729_v41, %v729_v41  ;;  %v1184_v11 = vand.u32 2147483647, %v729_v41  ;;  %1674 = vrcp.f32 %v1118_v3 }
 0x25f   : > { %v1065_v50 = vmax.f32 %v1061_v44, 1e-07  ;;  %v1189_v18 = vadd.f32 1e-07, %v1185_v5 }
 0x260   : > { %v1515_v46 = vpop.f32.mrb[6].mxu1  ;;  %v1064_v51 = vmax.f32 %v1060_v45, 1e-07  ;;  %v1188_v20 = vadd.f32 1e-07, %v1184_v11 }
 0x261   : > { %v804_v47 = vpop.f32.mrb[7].mxu1  ;;  %v1063_v57 = vmul.f32 %v1515_v46, %v1515_v46  ;;  %v1187_v22 = vand.u32 2147483647, %v1515_v46 }
 0x262   : > { %v1062_v60 = vmul.f32 %v804_v47, %v804_v47  ;;  %v1186_v25 = vand.u32 2147483647, %v804_v47 }
 0x263   : > { %v1067_v1 = vmax.f32 %v1063_v57, 1e-07  ;;  %v1669_v14 = vpop.eup %1668  ;;  %v1191_v2 = vadd.f32 1e-07, %v1187_v22 }
 0x264   : > { %v1532_v52 = vpop.f32.mrb[8].mxu1  ;;  %v1066_v4 = vmax.f32 %v1062_v60, 1e-07  ;;  %v1671_v15 = vpop.eup %1670  ;;  %v2283_v19 = vmul.f32 %v1669_v14, %v1109_v16  ;;  %v1190_v7 = vadd.f32 1e-07, %v1186_v25 }
 0x265   : > { %v1069_v53 = vsub.f32 %v1532_v52, %v1065_v50  ;;  %v976_v54 = vpop.f32.mrb[9].mxu1  ;;  %v2285_v21 = vmul.f32 %v1671_v15, %v1108_v17 }
 0x266   : > { %v1068_v55 = vsub.f32 %v976_v54, %v1064_v51  ;;  %vm1141_vm1 = vcmp.eq.f32.partialorder %v2283_v19, 0.0 }
 0x267   : > { %v1073_v61 = vand.u32 2147483647, %v1069_v53  ;;  %vm1140_vm2 = vcmp.eq.f32.partialorder %v2285_v21, 0.0  ;;  %v1673_v28 = vpop.eup %1672  ;;  %v1145_v29 = vsel %vm1141_vm1, 1e-07, %v2283_v19 }
 0x268   : > { %v1539_v58 = vpop.f32.mrb[10].mxu1  ;;  %v1072_v63 = vand.u32 2147483647, %v1068_v55  ;;  %v1675_v30 = vpop.eup %1674  ;;  %v1144_v31 = vsel %vm1140_vm2, 1e-07, %v2285_v21  ;;  %v2303_v37 = vmul.f32 %v1673_v28, %v1111_v32  ;;  %vm1129_vm2 = vcmp.gt.f32.partialorder %v2283_v19, 0.0 }
 0x269   : > { %v1051_v62 = vpop.f32.mrb[11].mxu1  ;;  %v1077_v6 = vadd.f32 1e-07, %v1073_v61  ;;  %v1071_v10 = vsub.f32 %v1539_v58, %v1067_v1  ;;  %v2301_v36 = vand.u32 2147483647, %v1145_v29  ;;  %v2308_v46 = vmul.f32 %v1675_v30, %v1110_v34 }
 0x26a   : > { %v1076_v12 = vadd.f32 1e-07, %v1072_v63  ;;  %v1070_v13 = vsub.f32 %v1051_v62, %v1066_v4  ;;  %v2305_v41 = vand.u32 2147483647, %v1144_v31  ;;  %vm1143_vm7 = vcmp.eq.f32.partialorder %v2303_v37, 0.0 }
 0x26b   : > { %1676 = vrsqrt.f32 %v1077_v6  ;;  %v1075_v23 = vand.u32 2147483647, %v1071_v10  ;;  %vm1089_vm3 = vcmp.eq.f32.partialorder %v1077_v6, inf  ;;  %v1092_v42 = vand.u32 2147483648, %v1077_v6 }
 0x26c   : > { %1678 = vrsqrt.f32 %v1076_v12  ;;  %v1074_v24 = vand.u32 2147483647, %v1070_v13  ;;  %vm1091_vm4 = vcmp.eq.f32.partialorder %v1077_v6, 0.0  ;;  %vm1082_vm5 = vcmp.eq.f32.partialorder %v1076_v12, inf }
 0x26d   : > { %1680 = vrcp.f32 %v1189_v18  ;;  %v2287_v26 = vadd.f32 1e-07, %v1075_v23  ;;  %v1085_v9 = vand.u32 2147483648, %v1076_v12  ;;  %vm1084_vm6 = vcmp.eq.f32.partialorder %v1076_v12, 0.0 }
 0x26e   : > { %v2289_v27 = vadd.f32 1e-07, %v1074_v24  ;;  %1682 = vrcp.f32 %v1188_v20  ;;  %v1147_v52 = vsel %vm1143_vm7, 1e-07, %v2303_v37  ;;  %vm1142_vm8 = vcmp.eq.f32.partialorder %v2308_v46, 0.0 }
 0x26f   : > { %1684 = vrsqrt.f32 %v2287_v26  ;;  %vm1103_vm9 = vcmp.eq.f32.partialorder %v2287_v26, inf  ;;  %v1106_v56 = vand.u32 2147483648, %v2287_v26  ;;  %vm1105_vm11 = vcmp.eq.f32.partialorder %v2287_v26, 0.0 }
 0x270   : > { %1686 = vrsqrt.f32 %v2289_v27  ;;  %vm1096_vm10 = vcmp.eq.f32.partialorder %v2289_v27, inf  ;;  %v1099_v57 = vand.u32 2147483648, %v2289_v27  ;;  %vm1098_vm12 = vcmp.eq.f32.partialorder %v2289_v27, 0.0 }
 0x271   : > { %1688 = vrcp.f32 %v1191_v2  ;;  %v1146_v61 = vsel %vm1142_vm8, 1e-07, %v2308_v46  ;;  %v2325_v3 = vand.u32 2147483647, %v1147_v52 }
 0x272   : > { %1690 = vrcp.f32 %v1190_v7  ;;  %v2327_v5 = vand.u32 2147483647, %v1146_v61  ;;  %v1164_v7 = vand.u32 2147483648, %v2301_v36 }
 0x273   : > { %1692 = vrsqrt.f32 %v2301_v36 }
 0x274   : > { %1694 = vrsqrt.f32 %v2305_v41 }
 0x275   : > { %v1677_v33 = vpop.eup %1676 }
 0x276   : > { %v1679_v35 = vpop.eup %1678  ;;  %v1088_v40 = vmul.f32 %v1677_v33, %v1077_v6 }
 0x277   : > { %v1081_v43 = vmul.f32 %v1679_v35, %v1076_v12  ;;  %v1681_v38 = vpop.eup %1680 }
 0x278   : > { %v1090_v44 = vsel %vm1089_vm3, %v1077_v6, %v1088_v40  ;;  %v1683_v39 = vpop.eup %1682  ;;  %vm1161_vm3 = vcmp.eq.f32.partialorder %v2301_v36, inf  ;;  %v1157_v40 = vand.u32 2147483648, %v2305_v41 }
 0x279   : > { %v1093_v45 = vsel %vm1091_vm4, %v1092_v42, %v1090_v44  ;;  %v1083_v8 = vsel %vm1082_vm5, %v1076_v12, %v1081_v43  ;;  %v1685_v49 = vpop.eup %1684  ;;  %vm1163_vm4 = vcmp.eq.f32.partialorder %v2301_v36, 0.0  ;;  %vm1128_vm5 = vcmp.gt.f32.partialorder %v2285_v21, 0.0 }
 0x27a   : > { %v1197_v47 = vmul.f32 %v1681_v38, %v1093_v45  ;;  %v1086_v48 = vsel %vm1084_vm6, %v1085_v9, %v1083_v8  ;;  %v1687_v51 = vpop.eup %1686  ;;  %v1102_v53 = vmul.f32 %v1685_v49, %v2287_v26  ;;  %vm1154_vm6 = vcmp.eq.f32.partialorder %v2305_v41, inf }
 0x27b   : > { %v1196_v50 = vmul.f32 %v1683_v39, %v1086_v48  ;;  %v1095_v54 = vmul.f32 %v1687_v51, %v2289_v27  ;;  %v1689_v55 = vpop.eup %1688  ;;  %v1171_v21 = vand.u32 2147483648, %v2327_v5 }
 0x27c   : > { %1696 = vrsqrt.f32 %v1197_v47  ;;  %v1691_v58 = vpop.eup %1690  ;;  %v1104_v59 = vsel %vm1103_vm9, %v2287_v26, %v1102_v53  ;;  %vm1209_vm13 = vcmp.eq.f32.partialorder %v1197_v47, inf  ;;  %v1212_v13 = vand.u32 2147483648, %v1197_v47 }
 0x27d   : > { %1698 = vrsqrt.f32 %v1196_v50  ;;  %v1097_v60 = vsel %vm1096_vm10, %v2289_v27, %v1095_v54  ;;  %v1107_v62 = vsel %vm1105_vm11, %v1106_v56, %v1104_v59  ;;  %v1693_v4 = vpop.eup %1692  ;;  %vm1211_vm14 = vcmp.eq.f32.partialorder %v1197_v47, 0.0 }
 0x27e   : > { %v1100_v63 = vsel %vm1098_vm12, %v1099_v57, %v1097_v60  ;;  %v1199_v0 = vmul.f32 %v1689_v55, %v1107_v62  ;;  %v1695_v6 = vpop.eup %1694  ;;  %vm1202_vm15 = vcmp.eq.f32.partialorder %v1196_v50, inf  ;;  %v1205_v16 = vand.u32 2147483648, %v1196_v50 }
 0x27f   : > { %v1198_v1 = vmul.f32 %v1691_v58, %v1100_v63  ;;  %vm1204_vm1 = vcmp.eq.f32.partialorder %v1196_v50, 0.0  ;;  %v1160_v20 = vmul.f32 %v1693_v4, %v2301_v36  ;;  %v1153_v24 = vmul.f32 %v1695_v6, %v2305_v41 }
 0x280   : > { %1700 = vrsqrt.f32 %v1199_v0  ;;  %vm1223_vm7 = vcmp.eq.f32.partialorder %v1199_v0, inf  ;;  %v1226_v30 = vand.u32 2147483648, %v1199_v0  ;;  %vm1225_vm8 = vcmp.eq.f32.partialorder %v1199_v0, 0.0 }
 0x281   : > { %1702 = vrsqrt.f32 %v1198_v1  ;;  %v1162_v2 = vsel %vm1161_vm3, %v2301_v36, %v1160_v20  ;;  %v1155_v29 = vsel %vm1154_vm6, %v2305_v41, %v1153_v24  ;;  %vm1216_vm9 = vcmp.eq.f32.partialorder %v1198_v1, inf }
 0x282   : > { %1704 = vrsqrt.f32 %v2325_v3  ;;  %v1219_v34 = vand.u32 2147483648, %v1198_v1  ;;  %vm1218_vm10 = vcmp.eq.f32.partialorder %v1198_v1, 0.0  ;;  %v1165_v44 = vsel %vm1163_vm4, %v1164_v7, %v1162_v2 }
 0x283   : > { %1706 = vrsqrt.f32 %v2327_v5  ;;  %vm1156_vm11 = vcmp.eq.f32.partialorder %v2305_v41, 0.0  ;;  %vm1175_vm12 = vcmp.eq.f32.partialorder %v2325_v3, inf  ;;  %v1178_v54 = vand.u32 2147483648, %v2325_v3 }
 0x284   : > { %v1158_v45 = vsel %vm1156_vm11, %v1157_v40, %v1155_v29 }
 0x286   : > { %v1697_v10 = vpop.eup %1696 }
 0x287   : > { %v1699_v11 = vpop.eup %1698  ;;  %v1208_v12 = vmul.f32 %v1697_v10, %v1197_v47 }
 0x288   : > { %v1201_v14 = vmul.f32 %v1699_v11, %v1196_v50 }
 0x289   : > { %v1210_v15 = vsel %vm1209_vm13, %v1197_v47, %v1208_v12  ;;  %v1945_v47 = vmov 0.0   ;;  %vm1168_vm13 = vcmp.eq.f32.partialorder %v2327_v5, inf }
 0x28a   : > { %v1213_v17 = vsel %vm1211_vm14, %v1212_v13, %v1210_v15  ;;  %v1203_v18 = vsel %vm1202_vm15, %v1196_v50, %v1201_v14  ;;  %v1701_v26 = vpop.eup %1700  ;;  %v1413_v48 = vsel %vm1129_vm2, 1.0, %v1945_v47  ;;  %v1412_v36 = vsel %vm1128_vm5, 1.0, %v1945_v47 }
 0x28b   : > { %v1229_v22 = vadd.f32 1.0, %v1213_v17  ;;  %v1206_v23 = vsel %vm1204_vm1, %v1205_v16, %v1203_v18  ;;  %v1703_v27 = vpop.eup %1702  ;;  %v1222_v28 = vmul.f32 %v1701_v26, %v1199_v0  ;;  %v1181_v50 = vmul.f32 %v1413_v48, %v1165_v44 }
 0x28c   : > { %v1228_v25 = vadd.f32 1.0, %v1206_v23  ;;  %v1215_v31 = vmul.f32 %v1703_v27, %v1198_v1  ;;  %v1705_v32 = vpop.eup %1704  ;;  %v1180_v51 = vmul.f32 %v1412_v36, %v1158_v45  ;;  %vm1131_vm14 = vcmp.gt.f32.partialorder %v2303_v37, 0.0 }
 0x28d   : > { %1708 = vrcp.f32 %v1229_v22  ;;  %v1224_v33 = vsel %vm1223_vm7, %v1199_v0, %v1222_v28  ;;  %v1707_v35 = vpop.eup %1706  ;;  %v1174_v8 = vmul.f32 %v1705_v32, %v2325_v3  ;;  %vm1177_vm15 = vcmp.eq.f32.partialorder %v2325_v3, 0.0 }
 0x28e   : > { %1710 = vrcp.f32 %v1228_v25  ;;  %v1227_v42 = vsel %vm1225_vm8, %v1226_v30, %v1224_v33  ;;  %v1217_v43 = vsel %vm1216_vm9, %v1198_v1, %v1215_v31  ;;  %v1167_v49 = vmul.f32 %v1707_v35, %v2327_v5 }
 0x28f   : > { %v1231_v9 = vadd.f32 1.0, %v1227_v42  ;;  %v1220_v38 = vsel %vm1218_vm10, %v1219_v34, %v1217_v43  ;;  %v1176_v53 = vsel %vm1175_vm12, %v2325_v3, %v1174_v8  ;;  %vm1130_vm1 = vcmp.gt.f32.partialorder %v2308_v46, 0.0 }
 0x290   : > { %v1230_v39 = vadd.f32 1.0, %v1220_v38  ;;  %v1169_v55 = vsel %vm1168_vm13, %v2327_v5, %v1167_v49  ;;  %v1179_v57 = vsel %vm1177_vm15, %v1178_v54, %v1176_v53  ;;  %vm1170_vm2 = vcmp.eq.f32.partialorder %v2327_v5, 0.0 }
 0x291   : > { %1712 = vrcp.f32 %v1231_v9  ;;  %v1172_v58 = vsel %vm1170_vm2, %v1171_v21, %v1169_v55  ;;  %v1415_v59 = vsel %vm1131_vm14, 1.0, %v1945_v47  ;;  %v1414_v60 = vsel %vm1130_vm1, 1.0, %v1945_v47 }
 0x292   : > { %1714 = vrcp.f32 %v1230_v39  ;;  %v1183_v37 = vmul.f32 %v1415_v59, %v1179_v57  ;;  %v1182_v62 = vmul.f32 %v1414_v60, %v1172_v58 }
 0x297   : > { %v1709_v41 = vpop.eup %1708 }
 0x298   : > { %v1711_v52 = vpop.eup %1710  ;;  %v1237_v19 = vmul.f32 %v1709_v41, %v1181_v50 }
 0x299   : > { %v1236_v56 = vmul.f32 %v1711_v52, %v1180_v51 }
 0x29a   : > { %1241 = vst.msk [vmem:[%s299_s24 + $0x8] sm:$0xff] %vm318_vm0, %v1237_v19 }
 0x29b   : > { %1240 = vst.msk [vmem:[%s299_s24] sm:$0xff] %vm318_vm0, %v1236_v56  ;;  %v1713_v61 = vpop.eup %1712 }
 0x29c   : > { %v1715_v63 = vpop.eup %1714  ;;  %v1239_v0 = vmul.f32 %v1713_v61, %v1183_v37 }
 0x29d   : > { %v1238_v46 = vmul.f32 %v1715_v63, %v1182_v62 }
 0x29e   : > { %1243 = vst.msk [vmem:[%s299_s24 + $0x18] sm:$0xff] %vm318_vm0, %v1239_v0 }
 0x29f   : > { %1242 = vst.msk [vmem:[%s299_s24 + $0x10] sm:$0xff] %vm318_vm0, %v1238_v46 }
 0x2a0   : > { %1871 = shalt.err (!%p1868_p13)
}
 0x2a1   : > { %s1872_s30 = scalar_lea.hbm %s2368_s12, 512  ;;  %s1876_s27 = scalar_lea.hbm %s2422_s5, 2048 }
 0x2a2   : > { %p1873_p4 = scmp.ne.s32.totalorder %s2368_s12, %s1872_s30  ;;  %p1877_p3 = scmp.lt.u32.totalorder %s2368_s12, %s2422_s5 }
 0x2a3   : > { %p1878_p10 = scmp.lt.u32.totalorder %s1876_s27, %s1872_s30  ;;  %p1880_p7 = scmp.lt.u32.totalorder %s1872_s30, %s2368_s12 }
 0x2a4   : > { %p1874_p8 = pnand %p1873_p4, %p2149_p0 }
 0x2a5   : > { %p1879_p5 = por %p1878_p10, %p1877_p3 }
 0x2a6   : > { %p1875_p6 = pneg %p1874_p8 }
 0x2a7   : > { %p1881_p11 = por %p1880_p7, %p1879_p5 }
 0x2a9   : > { %p1882_p1 = pnand %p1881_p11, %p1875_p6 }
 0x2ab   : > { %1885 = shalt.err (!%p1882_p1)
}
 0x2ac   : > { %s1947_s24 = smov 128   ;;  %s1948_s6 = smov 8  }
 0x2ad   : > { %1594 = dma.vmem_to_hbm [thread:$0]  (%p2149_p0), %s2370_s14, 512, %s2368_s12, %s2376_s22, %s1947_s24, %s1947_s24, %s1948_s6  }
 0x2ae PF: > { %p1626_p2 = scmp.ge.s32.totalorder %s1936_s21, 2  ;;  %s1274_s28 = sand.u32 1, %s1924_s18  }
 0x2af   : > { %p2442_p12 = scmp.ne.s32.totalorder %s2427_s25, 0  ;;  %s1275_s11 = scalar_lea.sflag [#allocation4], %s1274_s28 }
 0x2b1   : > { %p1614_p9 = pnand %p1626_p2, %p2442_p12 }
 0x2b3   : > { %1919 = dma.done.wait (!%p1614_p9), %s1275_s11, 512  }
 0x2b4   : > { %1921 = vsyncadd (!%p1614_p9), %s1275_s11, 4294966784  ;;  %p18_p13 = scmp.ge.s32.totalorder %s2139_s29, 6   ;;  %s2443_s18 = smov %s1928_s19 }
 0x2b5   : > { %s2444_s19 = smov %s1932_s20  ;;  %s2445_s20 = smov %s2155_s7 }
 0x2b6   : > { %s2446_s21 = smov %s2139_s29  ;;  %20 = sbr.rel (!%p18_p13) target bundleno = 6 (0x6), region = 100 }
 0x2bd   :  { %1280 = vsyncpa [#allocation3], 1 }
 0x2be   :  { %1282 = vsyncpa [#allocation3 + $0x1], 1 }
 0x2bf   :  { %1283 = vsyncpa [#allocation6], 1 }
 0x2c0   :  { %1284 = vsyncpa [#allocation9], 1 }
 0x2c1   :  { %1285 = vsyncpa [#allocation4], 1 }
 0x2c2   :  { %1287 = vsyncpa [#allocation4 + $0x1], 1 }

</bundles_post_ra>
